<compile_context>
chip_gen: v7x
topology: tpu7x:2x2x1
jax: 0.10.0
libtpu: 0.0.40
codegen_flags: <defaults>
</compile_context>

<pallas_src>
import jax
import jax.numpy as jnp
from jax.experimental import pallas as pl
from jax.experimental.pallas import tpu as pltpu

ROBOT_STATE_DIM = 6
ROBOT_SCAN_DIM = 720
OBS_DIM = ROBOT_STATE_DIM + ROBOT_SCAN_DIM

SCAN_REPR_DIM = 64     # ScanEncoder.repr_dim
STATE_REPR_DIM = 64    # StateEncoder.repr_dim (== feature_extractor.repr_dim)
HIDDEN_SIZES = (64, 64)
ACT_DIM = 2


def _round_up(x, m):
    return ((x + m - 1) // m) * m


# ---------------------------------------------------------------------------
# Kernel
# ---------------------------------------------------------------------------
def _policy_kernel(obs_ref,
                   w_l1_ref, b_l1_ref,
                   w_se_scan_ref,
                   w1_ref, b1_ref, w2_ref, b2_ref, w3_ref, b3_ref,
                   scale_ref, mean_ref,
                   out_ref):
    f32 = jnp.float32
    hdt = w_se_scan_ref.dtype          # hidden-stack MXU input dtype (bf16)

    obs = obs_ref[...]                 # (TB, 726), stream dtype (bf16)

    # Fused first layer: one (TB,726)x(726,128) MXU pass.
    #   cols 0:64   -> ScanEncoder pre-activation (robot_state rows zeroed)
    #   cols 64:128 -> StateEncoder state-half pre-activation (scan rows zeroed)
    # b_l1 = concat([b_scan, b_se]) so both biases ride along.
    z = jnp.dot(obs, w_l1_ref[...], preferred_element_type=f32) + b_l1_ref[...]

    scan_h = jnp.maximum(z[:, :SCAN_REPR_DIM], 0.0)          # ReLU(ScanEncoder)

    # StateEncoder: state-half (already in z, incl. b_se) + scan_h-half, then ReLU.
    h = jnp.maximum(
        z[:, SCAN_REPR_DIM:]
        + jnp.dot(scan_h.astype(hdt), w_se_scan_ref[...], preferred_element_type=f32),
        0.0)

    # PlainMLP: relu -> relu -> tanh (final_activation_func). bf16 MXU inputs,
    # f32 accumulation; biases/activations stay f32.
    x = jnp.maximum(
        jnp.dot(h.astype(hdt), w1_ref[...], preferred_element_type=f32) + b1_ref[...], 0.0)
    x = jnp.maximum(
        jnp.dot(x.astype(hdt), w2_ref[...], preferred_element_type=f32) + b2_ref[...], 0.0)
    x = jnp.tanh(
        jnp.dot(x.astype(hdt), w3_ref[...], preferred_element_type=f32) + b3_ref[...])

    # Action rescale: scale * x + mean  (N=2 masked stores are negligible vs the
    # ~1.45 KB/row obs read).
    out_ref[...] = scale_ref[...] * x + mean_ref[...]


# ---------------------------------------------------------------------------
# Parameter preparation (done once, outside the hot path)
# ---------------------------------------------------------------------------
def prepare_params(params, stream_dtype=jnp.bfloat16, hidden_dtype=jnp.bfloat16):
    """Build kernel-ready params: fused + zero-padded first-layer weight in the
    obs stream dtype, hidden-stack weights in bf16, biases/scale/mean f32."""
    f32 = jnp.float32

    w_scan = params["w_scan"].astype(f32)          # (720, 64)
    w_se = params["w_se"].astype(f32)              # (70, 64)

    # Fused first-layer weight (726, 128):
    #   cols 0:64   = ScanEncoder weight, zero rows on the 6 robot_state lanes
    #   cols 64:128 = StateEncoder state-half, zero rows on the 720 scan lanes
    w_l1 = jnp.zeros((OBS_DIM, SCAN_REPR_DIM + STATE_REPR_DIM), f32)
    w_l1 = w_l1.at[ROBOT_STATE_DIM:, :SCAN_REPR_DIM].set(w_scan)
    w_l1 = w_l1.at[:ROBOT_STATE_DIM, SCAN_REPR_DIM:].set(w_se[:ROBOT_STATE_DIM])

    b_l1 = jnp.concatenate(
        [params["b_scan"].astype(f32).reshape(1, -1),
         params["b_se"].astype(f32).reshape(1, -1)], axis=-1)      # (1, 128)

    return dict(
        w_l1=w_l1.astype(stream_dtype),
        b_l1=b_l1,
        w_se_scan=w_se[ROBOT_STATE_DIM:].astype(hidden_dtype),     # (64, 64)
        w1=params["w1"].astype(hidden_dtype), b1=params["b1"].astype(f32),
        w2=params["w2"].astype(hidden_dtype), b2=params["b2"].astype(f32),
        w3=params["w3"].astype(hidden_dtype), b3=params["b3"].astype(f32),
        scale=params["scale"].astype(f32), mean=params["mean"].astype(f32),
    )


# ---------------------------------------------------------------------------
# Forward wrapper
# ---------------------------------------------------------------------------
def _choose_tile(batch, block_batch, sub, min_grid_steps):
    """Pick a batch tile: (8,128)-legal, <= block_batch, and (when batch allows)
    small enough that the grid has >= min_grid_steps steps so v7x's two
    TensorCores both get work via dimension_semantics=('parallel',)."""
    if batch <= sub:
        return batch                                  # single block == full batch
    n_target = max(min_grid_steps, pl.cdiv(batch, block_batch))
    tb = _round_up(pl.cdiv(batch, n_target), sub)
    tb = min(tb, block_batch, _round_up(batch, sub))
    return tb


def deterministic_policy_forward(obs, prepared, *, block_batch=1024,
                                 min_grid_steps=2):
    """obs: [B, 726] (pass bf16; f32 works but doubles HBM traffic) -> [B, ACT_DIM] f32."""
    batch, obs_dim = obs.shape
    assert obs_dim == OBS_DIM, obs.shape
    act_dim = prepared["w3"].shape[1]

    itemsize = jnp.dtype(obs.dtype).itemsize
    sub = 16 if itemsize < 4 else 8                   # sublane packing (bf16 vs f32)
    tb = _choose_tile(batch, block_batch, sub, min_grid_steps)
    grid = (pl.cdiv(batch, tb),)                      # partial edge block is masked
                                                      # by Pallas: no jnp.pad, no
                                                      # out[:batch] copy needed.

    weights = (prepared["w_l1"], prepared["b_l1"],
               prepared["w_se_scan"],
               prepared["w1"], prepared["b1"],
               prepared["w2"], prepared["b2"],
               prepared["w3"], prepared["b3"],
               prepared["scale"], prepared["mean"])

    def _resident(a):
        # Full-array block + constant index_map -> param stays VMEM-resident
        # across every grid step (no per-step re-DMA of weights/biases).
        return pl.BlockSpec(a.shape, lambda *_: (0,) * a.ndim)

    out = pl.pallas_call(
        _policy_kernel,
        out_shape=jax.ShapeDtypeStruct((batch, act_dim), jnp.float32),
        grid=grid,
        in_specs=[pl.BlockSpec((tb, OBS_DIM), lambda i: (i, 0))]
                 + [_resident(w) for w in weights],
        out_specs=pl.BlockSpec((tb, act_dim), lambda i: (i, 0)),
        compiler_params=pltpu.CompilerParams(
            dimension_semantics=("parallel",)),
    )(obs, *weights)
    return out


# ---------------------------------------------------------------------------
# Synthetic params + pure-JAX reference
# ---------------------------------------------------------------------------
def init_params(key):
    """Deterministic synthetic parameters (shapes follow the module's __init__)."""
    def dense(k, fan_in, fan_out):
        kw, _ = jax.random.split(k)
        w = jax.random.normal(kw, (fan_in, fan_out), jnp.float32) / jnp.sqrt(
            jnp.float32(fan_in))
        b = jnp.zeros((1, fan_out), jnp.float32)
        return w, b

    keys = jax.random.split(key, 5)
    w_scan, b_scan = dense(keys[0], ROBOT_SCAN_DIM, SCAN_REPR_DIM)
    w_se, b_se = dense(keys[1], ROBOT_STATE_DIM + SCAN_REPR_DIM, STATE_REPR_DIM)
    w1, b1 = dense(keys[2], STATE_REPR_DIM, HIDDEN_SIZES[0])
    w2, b2 = dense(keys[3], HIDDEN_SIZES[0], HIDDEN_SIZES[1])
    w3, b3 = dense(keys[4], HIDDEN_SIZES[1], ACT_DIM)

    # action_space bounds -> scale = (high - low)/2, mean = (high + low)/2
    low = jnp.array([[-2.0, -0.5]], jnp.float32)
    high = jnp.array([[2.0, 1.5]], jnp.float32)
    scale = (high - low) / 2.0
    mean = (high + low) / 2.0

    return dict(w_scan=w_scan, b_scan=b_scan, w_se=w_se, b_se=b_se,
                w1=w1, b1=b1, w2=w2, b2=b2, w3=w3, b3=b3,
                scale=scale, mean=mean)


def reference_forward(obs, params, stream_dtype=jnp.float32,
                      hidden_dtype=jnp.float32):
    """Pure-JAX reference mirroring the PyTorch module. `stream_dtype` /
    `hidden_dtype` reproduce the rounding the kernel applies to obs / the
    obs-facing weights / the hidden-stack MXU inputs (the rest is f32)."""
    f32 = jnp.float32

    def sd(x):
        return x.astype(stream_dtype).astype(f32)

    def hd(x):
        return x.astype(hidden_dtype).astype(f32)

    obs = sd(obs.astype(f32))
    state = obs[:, :ROBOT_STATE_DIM]
    scan = obs[:, ROBOT_STATE_DIM:OBS_DIM]

    w_se = params["w_se"].astype(f32)
    scan_h = jax.nn.relu(scan @ sd(params["w_scan"]) + params["b_scan"])
    h = jax.nn.relu(state @ sd(w_se[:ROBOT_STATE_DIM]) + params["b_se"]
                    + hd(scan_h) @ hd(w_se[ROBOT_STATE_DIM:]))
    x = jax.nn.relu(hd(h) @ hd(params["w1"]) + params["b1"])
    x = jax.nn.relu(hd(x) @ hd(params["w2"]) + params["b2"])
    x = jnp.tanh(hd(x) @ hd(params["w3"]) + params["b3"])
    return params["scale"] * x + params["mean"]


if __name__ == "__main__":
    key = jax.random.PRNGKey(0)
    k_params, k_obs = jax.random.split(key)

    params = init_params(k_params)
    stream_dtype = jnp.bfloat16
    hidden_dtype = jnp.bfloat16
    prepared = prepare_params(params, stream_dtype=stream_dtype,
                              hidden_dtype=hidden_dtype)

    def run_case(batch, block_batch):
        obs_f32 = jax.random.normal(k_obs, (batch, OBS_DIM), jnp.float32)
        obs = obs_f32.astype(stream_dtype)   # obs arrives in bf16 (caller contract)
        actions = jax.block_until_ready(
            deterministic_policy_forward(obs, prepared, block_batch=block_batch))
        ref = jax.block_until_ready(
            reference_forward(obs_f32, params, stream_dtype=stream_dtype,
                              hidden_dtype=hidden_dtype))
        assert actions.shape == (batch, ACT_DIM), actions.shape
        assert jnp.allclose(actions, ref, atol=2e-3, rtol=2e-3), (actions, ref)

    # Small primary case (single partial tile).
    run_case(batch=2, block_batch=1024)
    # Multi-step grid with a masked partial tail block (covers pipelined path).
    run_case(batch=37, block_batch=16)

    print("KERNEL_OK")
</pallas_src>

<mosaic_0001>
module attributes {stable_mosaic.version = 11 : i64} {
  func.func @_policy_kernel(%arg0: i32, %arg1: memref<2x726xbf16, #tpu.memory_space<vmem>>, %arg2: memref<726x128xbf16, #tpu.memory_space<vmem>>, %arg3: memref<1x128xf32, #tpu.memory_space<vmem>>, %arg4: memref<64x64xbf16, #tpu.memory_space<vmem>>, %arg5: memref<64x64xbf16, #tpu.memory_space<vmem>>, %arg6: memref<1x64xf32, #tpu.memory_space<vmem>>, %arg7: memref<64x64xbf16, #tpu.memory_space<vmem>>, %arg8: memref<1x64xf32, #tpu.memory_space<vmem>>, %arg9: memref<64x2xbf16, #tpu.memory_space<vmem>>, %arg10: memref<1x2xf32, #tpu.memory_space<vmem>>, %arg11: memref<1x2xf32, #tpu.memory_space<vmem>>, %arg12: memref<1x2xf32, #tpu.memory_space<vmem>>, %arg13: memref<2x2xf32, #tpu.memory_space<vmem>>) attributes {dimension_semantics = [#tpu.dimension_semantics<parallel>], iteration_bounds = array<i64: 1>, scalar_prefetch = 0 : i64, scratch_operands = 0 : i64, tpu.core_type = #tpu.core_type<tc>, window_params = [{transform_indices = @transform_0, window_bounds = array<i64: 2, 726>}, {pipeline_mode = #tpu.pipeline_mode<synchronous>, transform_indices = @transform_1, window_bounds = array<i64: 726, 128>}, {pipeline_mode = #tpu.pipeline_mode<synchronous>, transform_indices = @transform_2, window_bounds = array<i64: 1, 128>}, {pipeline_mode = #tpu.pipeline_mode<synchronous>, transform_indices = @transform_3, window_bounds = array<i64: 64, 64>}, {pipeline_mode = #tpu.pipeline_mode<synchronous>, transform_indices = @transform_4, window_bounds = array<i64: 64, 64>}, {pipeline_mode = #tpu.pipeline_mode<synchronous>, transform_indices = @transform_5, window_bounds = array<i64: 1, 64>}, {pipeline_mode = #tpu.pipeline_mode<synchronous>, transform_indices = @transform_6, window_bounds = array<i64: 64, 64>}, {pipeline_mode = #tpu.pipeline_mode<synchronous>, transform_indices = @transform_7, window_bounds = array<i64: 1, 64>}, {pipeline_mode = #tpu.pipeline_mode<synchronous>, transform_indices = @transform_8, window_bounds = array<i64: 64, 2>}, {pipeline_mode = #tpu.pipeline_mode<synchronous>, transform_indices = @transform_9, window_bounds = array<i64: 1, 2>}, {pipeline_mode = #tpu.pipeline_mode<synchronous>, transform_indices = @transform_10, window_bounds = array<i64: 1, 2>}, {pipeline_mode = #tpu.pipeline_mode<synchronous>, transform_indices = @transform_11, window_bounds = array<i64: 1, 2>}, {transform_indices = @transform_12, window_bounds = array<i64: 2, 2>}]} {
    %c0 = arith.constant 0 : index
    %c0_0 = arith.constant 0 : index
    %0 = vector.load %arg1[%c0, %c0_0] : memref<2x726xbf16, #tpu.memory_space<vmem>>, vector<2x726xbf16>
    %c0_1 = arith.constant 0 : index
    %c0_2 = arith.constant 0 : index
    %1 = vector.load %arg2[%c0_1, %c0_2] : memref<726x128xbf16, #tpu.memory_space<vmem>>, vector<726x128xbf16>
    %cst = arith.constant dense<0.000000e+00> : vector<2x128xf32>
    %2 = tpu.matmul %0, %1, %cst {dimension_numbers = #tpu.dot_dimension_numbers<[1], [0], [0], [1], [0, 0, 1, 1], [], []>} : vector<2x726xbf16>, vector<726x128xbf16>, vector<2x128xf32> -> vector<2x128xf32>
    %c0_3 = arith.constant 0 : index
    %c0_4 = arith.constant 0 : index
    %3 = vector.load %arg3[%c0_3, %c0_4] : memref<1x128xf32, #tpu.memory_space<vmem>>, vector<1x128xf32>
    %4 = vector.broadcast %3 : vector<1x128xf32> to vector<2x128xf32>
    %5 = arith.addf %2, %4 : vector<2x128xf32>
    %6 = vector.extract_strided_slice %5 {offsets = [0, 0], sizes = [2, 64], strides = [1, 1]} : vector<2x128xf32> to vector<2x64xf32>
    %cst_5 = arith.constant 0.000000e+00 : f32
    %7 = vector.broadcast %cst_5 : f32 to vector<2x64xf32>
    %8 = arith.maximumf %6, %7 : vector<2x64xf32>
    %9 = vector.extract_strided_slice %5 {offsets = [0, 64], sizes = [2, 64], strides = [1, 1]} : vector<2x128xf32> to vector<2x64xf32>
    %10 = arith.truncf %8 : vector<2x64xf32> to vector<2x64xbf16>
    %c0_6 = arith.constant 0 : index
    %c0_7 = arith.constant 0 : index
    %11 = vector.load %arg4[%c0_6, %c0_7] : memref<64x64xbf16, #tpu.memory_space<vmem>>, vector<64x64xbf16>
    %cst_8 = arith.constant dense<0.000000e+00> : vector<2x64xf32>
    %12 = tpu.matmul %10, %11, %cst_8 {dimension_numbers = #tpu.dot_dimension_numbers<[1], [0], [0], [1], [0, 0, 1, 1], [], []>} : vector<2x64xbf16>, vector<64x64xbf16>, vector<2x64xf32> -> vector<2x64xf32>
    %13 = arith.addf %9, %12 : vector<2x64xf32>
    %cst_9 = arith.constant 0.000000e+00 : f32
    %14 = vector.broadcast %cst_9 : f32 to vector<2x64xf32>
    %15 = arith.maximumf %13, %14 : vector<2x64xf32>
    %16 = arith.truncf %15 : vector<2x64xf32> to vector<2x64xbf16>
    %c0_10 = arith.constant 0 : index
    %c0_11 = arith.constant 0 : index
    %17 = vector.load %arg5[%c0_10, %c0_11] : memref<64x64xbf16, #tpu.memory_space<vmem>>, vector<64x64xbf16>
    %cst_12 = arith.constant dense<0.000000e+00> : vector<2x64xf32>
    %18 = tpu.matmul %16, %17, %cst_12 {dimension_numbers = #tpu.dot_dimension_numbers<[1], [0], [0], [1], [0, 0, 1, 1], [], []>} : vector<2x64xbf16>, vector<64x64xbf16>, vector<2x64xf32> -> vector<2x64xf32>
    %c0_13 = arith.constant 0 : index
    %c0_14 = arith.constant 0 : index
    %19 = vector.load %arg6[%c0_13, %c0_14] : memref<1x64xf32, #tpu.memory_space<vmem>>, vector<1x64xf32>
    %20 = vector.broadcast %19 : vector<1x64xf32> to vector<2x64xf32>
    %21 = arith.addf %18, %20 : vector<2x64xf32>
    %cst_15 = arith.constant 0.000000e+00 : f32
    %22 = vector.broadcast %cst_15 : f32 to vector<2x64xf32>
    %23 = arith.maximumf %21, %22 : vector<2x64xf32>
    %24 = arith.truncf %23 : vector<2x64xf32> to vector<2x64xbf16>
    %c0_16 = arith.constant 0 : index
    %c0_17 = arith.constant 0 : index
    %25 = vector.load %arg7[%c0_16, %c0_17] : memref<64x64xbf16, #tpu.memory_space<vmem>>, vector<64x64xbf16>
    %cst_18 = arith.constant dense<0.000000e+00> : vector<2x64xf32>
    %26 = tpu.matmul %24, %25, %cst_18 {dimension_numbers = #tpu.dot_dimension_numbers<[1], [0], [0], [1], [0, 0, 1, 1], [], []>} : vector<2x64xbf16>, vector<64x64xbf16>, vector<2x64xf32> -> vector<2x64xf32>
    %c0_19 = arith.constant 0 : index
    %c0_20 = arith.constant 0 : index
    %27 = vector.load %arg8[%c0_19, %c0_20] : memref<1x64xf32, #tpu.memory_space<vmem>>, vector<1x64xf32>
    %28 = vector.broadcast %27 : vector<1x64xf32> to vector<2x64xf32>
    %29 = arith.addf %26, %28 : vector<2x64xf32>
    %cst_21 = arith.constant 0.000000e+00 : f32
    %30 = vector.broadcast %cst_21 : f32 to vector<2x64xf32>
    %31 = arith.maximumf %29, %30 : vector<2x64xf32>
    %32 = arith.truncf %31 : vector<2x64xf32> to vector<2x64xbf16>
    %c0_22 = arith.constant 0 : index
    %c0_23 = arith.constant 0 : index
    %33 = vector.load %arg9[%c0_22, %c0_23] : memref<64x2xbf16, #tpu.memory_space<vmem>>, vector<64x2xbf16>
    %cst_24 = arith.constant dense<0.000000e+00> : vector<2x2xf32>
    %34 = tpu.matmul %32, %33, %cst_24 {dimension_numbers = #tpu.dot_dimension_numbers<[1], [0], [0], [1], [0, 0, 1, 1], [], []>} : vector<2x64xbf16>, vector<64x2xbf16>, vector<2x2xf32> -> vector<2x2xf32>
    %c0_25 = arith.constant 0 : index
    %c0_26 = arith.constant 0 : index
    %35 = vector.load %arg10[%c0_25, %c0_26] : memref<1x2xf32, #tpu.memory_space<vmem>>, vector<1x2xf32>
    %36 = vector.broadcast %35 : vector<1x2xf32> to vector<2x2xf32>
    %37 = arith.addf %34, %36 : vector<2x2xf32>
    %38 = math.tanh %37 : vector<2x2xf32>
    %c0_27 = arith.constant 0 : index
    %c0_28 = arith.constant 0 : index
    %39 = vector.load %arg11[%c0_27, %c0_28] : memref<1x2xf32, #tpu.memory_space<vmem>>, vector<1x2xf32>
    %40 = vector.broadcast %39 : vector<1x2xf32> to vector<2x2xf32>
    %41 = arith.mulf %40, %38 : vector<2x2xf32>
    %c0_29 = arith.constant 0 : index
    %c0_30 = arith.constant 0 : index
    %42 = vector.load %arg12[%c0_29, %c0_30] : memref<1x2xf32, #tpu.memory_space<vmem>>, vector<1x2xf32>
    %43 = vector.broadcast %42 : vector<1x2xf32> to vector<2x2xf32>
    %44 = arith.addf %41, %43 : vector<2x2xf32>
    %c0_31 = arith.constant 0 : index
    %c0_32 = arith.constant 0 : index
    %45 = vector.load %arg13[%c0_31, %c0_32] : memref<2x2xf32, #tpu.memory_space<vmem>>, vector<2x2xf32>
    tpu.vector_store %arg13[%c0_31, %c0_32], %44 {strides = array<i32>} : memref<2x2xf32, #tpu.memory_space<vmem>>, vector<2x2xf32>,
    return
  }
  func.func @transform_0(%arg0: i32) -> (i32, i32) {
    %c0_i32 = arith.constant 0 : i32
    %c0_i32_0 = arith.constant 0 : i32
    return %arg0, %c0_i32 : i32, i32
  }
  func.func @transform_1(%arg0: i32) -> (i32, i32) {
    %c0_i32 = arith.constant 0 : i32
    %c0_i32_0 = arith.constant 0 : i32
    %c0_i32_1 = arith.constant 0 : i32
    return %c0_i32, %c0_i32_0 : i32, i32
  }
  func.func @transform_2(%arg0: i32) -> (i32, i32) {
    %c0_i32 = arith.constant 0 : i32
    %c0_i32_0 = arith.constant 0 : i32
    %c0_i32_1 = arith.constant 0 : i32
    return %c0_i32, %c0_i32_0 : i32, i32
  }
  func.func @transform_3(%arg0: i32) -> (i32, i32) {
    %c0_i32 = arith.constant 0 : i32
    %c0_i32_0 = arith.constant 0 : i32
    %c0_i32_1 = arith.constant 0 : i32
    return %c0_i32, %c0_i32_0 : i32, i32
  }
  func.func @transform_4(%arg0: i32) -> (i32, i32) {
    %c0_i32 = arith.constant 0 : i32
    %c0_i32_0 = arith.constant 0 : i32
    %c0_i32_1 = arith.constant 0 : i32
    return %c0_i32, %c0_i32_0 : i32, i32
  }
  func.func @transform_5(%arg0: i32) -> (i32, i32) {
    %c0_i32 = arith.constant 0 : i32
    %c0_i32_0 = arith.constant 0 : i32
    %c0_i32_1 = arith.constant 0 : i32
    return %c0_i32, %c0_i32_0 : i32, i32
  }
  func.func @transform_6(%arg0: i32) -> (i32, i32) {
    %c0_i32 = arith.constant 0 : i32
    %c0_i32_0 = arith.constant 0 : i32
    %c0_i32_1 = arith.constant 0 : i32
    return %c0_i32, %c0_i32_0 : i32, i32
  }
  func.func @transform_7(%arg0: i32) -> (i32, i32) {
    %c0_i32 = arith.constant 0 : i32
    %c0_i32_0 = arith.constant 0 : i32
    %c0_i32_1 = arith.constant 0 : i32
    return %c0_i32, %c0_i32_0 : i32, i32
  }
  func.func @transform_8(%arg0: i32) -> (i32, i32) {
    %c0_i32 = arith.constant 0 : i32
    %c0_i32_0 = arith.constant 0 : i32
    %c0_i32_1 = arith.constant 0 : i32
    return %c0_i32, %c0_i32_0 : i32, i32
  }
  func.func @transform_9(%arg0: i32) -> (i32, i32) {
    %c0_i32 = arith.constant 0 : i32
    %c0_i32_0 = arith.constant 0 : i32
    %c0_i32_1 = arith.constant 0 : i32
    return %c0_i32, %c0_i32_0 : i32, i32
  }
  func.func @transform_10(%arg0: i32) -> (i32, i32) {
    %c0_i32 = arith.constant 0 : i32
    %c0_i32_0 = arith.constant 0 : i32
    %c0_i32_1 = arith.constant 0 : i32
    return %c0_i32, %c0_i32_0 : i32, i32
  }
  func.func @transform_11(%arg0: i32) -> (i32, i32) {
    %c0_i32 = arith.constant 0 : i32
    %c0_i32_0 = arith.constant 0 : i32
    %c0_i32_1 = arith.constant 0 : i32
    return %c0_i32, %c0_i32_0 : i32, i32
  }
  func.func @transform_12(%arg0: i32) -> (i32, i32) {
    %c0_i32 = arith.constant 0 : i32
    %c0_i32_0 = arith.constant 0 : i32
    return %arg0, %c0_i32 : i32, i32
  }
}

</mosaic_0001>

<bundles_post_ra>
// kernel: tpu_custom_call.1
= control target key start
LH: loop header
LB: loop body
LE: loop exit
PB: predicated region body
PF: predicated region fallthrough
CT: control target
= control target key end

     0   :  { %17 = vsyncpa [#allocation3], 0  ;;  %s1586_s0 = inlined_call_operand.vmem [shape: bf16[2,726], index: 0, kind: input, shape index: {}]   ;;  %s1587_s1 = inlined_call_operand.hbm [shape: bf16[726,128], index: 1, kind: input, shape index: {}]   ;;  %s1588_s2 = inlined_call_operand.vmem [shape: f32[1,128], index: 2, kind: input, shape index: {}]   ;;  %s1589_s3 = inlined_call_operand.vmem [shape: bf16[64,64], index: 3, kind: input, shape index: {}]   ;;  %s1590_s4 = inlined_call_operand.hbm [shape: bf16[64,64], index: 4, kind: input, shape index: {}]   ;;  %s1591_s5 = inlined_call_operand.vmem [shape: f32[1,64], index: 5, kind: input, shape index: {}]   ;;  %s1592_s6 = inlined_call_operand.hbm [shape: bf16[64,64], index: 6, kind: input, shape index: {}]   ;;  %s1593_s7 = inlined_call_operand.vmem [shape: f32[1,64], index: 7, kind: input, shape index: {}]   ;;  %s1594_s8 = inlined_call_operand.vmem [shape: bf16[64,2], index: 8, kind: input, shape index: {}]   ;;  %s1595_s9 = inlined_call_operand.vmem [shape: f32[1,2], index: 9, kind: input, shape index: {}]   ;;  %s1596_s10 = inlined_call_operand.vmem [shape: f32[1,2], index: 10, kind: input, shape index: {}]   ;;  %s1597_s11 = inlined_call_operand.vmem [shape: f32[1,2], index: 11, kind: input, shape index: {}]   ;;  %s1598_s12 = inlined_call_operand.hbm [shape: f32[2,2], index: 12, kind: output, shape index: {}]  }
   0x1   :  { %18 = vsyncpa [#allocation6], 0 }
   0x2   :  { %19 = vsyncpa [#allocation4], 0  ;;  %s1364_s21 = smov [#allocation5]   ;;  %s1365_s23 = smov [#allocation2]  }
   0x3   :  { %s43_s22 = sshll.u32 %s1364_s21, 4  ;;  %s27_s24 = sshll.u32 %s1365_s23, 4  ;;  %s44_s22 = int_to_ptr.vmem [resolvable:$true] %s43_s22  ;;  %s1439_s24 = int_to_ptr.vmem [resolvable:$true] %s27_s24 }
   0x4   :  { %s1270_s27 = scalar_lea.hbm %s1590_s4, 512 }
   0x5   :  { %p1271_p0 = scmp.ne.s32.totalorder %s1590_s4, %s1270_s27  ;;  %p1274_p1 = scmp.lt.u32.totalorder %s1270_s27, %s1590_s4 }
   0x7   :  { %p1276_p2 = pnand %p1274_p1, %p1271_p0 }
   0x9   :  { %1279 = shalt.err (!%p1276_p2)
}
   0xa   :  { %s1280_s14 = scalar_lea.vmem %s44_s22, 512  ;;  %p1285_p4 = scmp.lt.s32.totalorder %s44_s22, %s44_s22 }
   0xb   :  { %p1281_p3 = scmp.ne.s32.totalorder %s44_s22, %s1280_s14  ;;  %p1286_p5 = scmp.lt.s32.totalorder %s1280_s14, %s1280_s14 }
   0xd   :  { %p1287_p6 = por %p1286_p5, %p1285_p4 }
   0xf   :  { %p1288_p7 = pnand %p1287_p6, %p1281_p3 }
  0x11   :  { %1291 = shalt.err (!%p1288_p7)
}
  0x12   :  { %s1366_s15 = smov 64   ;;  %s1367_s16 = smov 4  }
  0x13   :  { %49 = dma.hbm_to_vmem [thread:$0]  %s1590_s4, 512, %s44_s22, [#allocation6], %s1366_s15, %s1366_s15, %s1367_s16  }
  0x14   :  { %s1292_s21 = scalar_lea.hbm %s1587_s1, 5824 }
  0x15   :  { %p1293_p8 = scmp.ne.s32.totalorder %s1587_s1, %s1292_s21  ;;  %p1296_p9 = scmp.lt.u32.totalorder %s1292_s21, %s1587_s1 }
  0x17   :  { %p1298_p10 = pnand %p1296_p9, %p1293_p8 }
  0x19   :  { %1301 = shalt.err (!%p1298_p10)
}
  0x1a   :  { %s1302_s28 = scalar_lea.vmem %s1439_s24, 5824  ;;  %p1307_p12 = scmp.lt.s32.totalorder %s1439_s24, %s1439_s24 }
  0x1b   :  { %p1303_p11 = scmp.ne.s32.totalorder %s1439_s24, %s1302_s28  ;;  %p1308_p13 = scmp.lt.s32.totalorder %s1302_s28, %s1302_s28 }
  0x1d   :  { %p1309_p0 = por %p1308_p13, %p1307_p12 }
  0x1f   :  { %p1310_p1 = pnand %p1309_p0, %p1303_p11 }
  0x21   :  { %1313 = shalt.err (!%p1310_p1)
}
  0x22   :  { %33 = dma.hbm_to_vmem [thread:$0]  %s1587_s1, 5824, %s1439_s24, [#allocation3], %s1366_s15, %s1366_s15, %s1367_s16  }
  0x23   :  { %s1368_s29 = smov [#allocation7]   ;;  %s1314_s17 = scalar_lea.hbm %s1592_s6, 512 }
  0x24   :  { %s57_s30 = sshll.u32 %s1368_s29, 4  ;;  %p1315_p2 = scmp.ne.s32.totalorder %s1592_s6, %s1314_s17  ;;  %s58_s30 = int_to_ptr.vmem [resolvable:$true] %s57_s30 }
  0x25   :  { %p1318_p3 = scmp.lt.u32.totalorder %s1314_s17, %s1592_s6 }
  0x27   :  { %p1320_p4 = pnand %p1318_p3, %p1315_p2 }
  0x29   :  { %1323 = shalt.err (!%p1320_p4)
}
  0x2a   :  { %s1324_s23 = scalar_lea.vmem %s58_s30, 512  ;;  %p1329_p6 = scmp.lt.s32.totalorder %s58_s30, %s58_s30 }
  0x2b   :  { %p1325_p5 = scmp.ne.s32.totalorder %s58_s30, %s1324_s23  ;;  %p1330_p7 = scmp.lt.s32.totalorder %s1324_s23, %s1324_s23 }
  0x2d   :  { %p1331_p8 = por %p1330_p7, %p1329_p6 }
  0x2f   :  { %p1332_p9 = pnand %p1331_p8, %p1325_p5 }
  0x31   :  { %1335 = shalt.err (!%p1332_p9)
}
  0x32   :  { %63 = dma.hbm_to_vmem [thread:$0]  %s1592_s6, 512, %s58_s30, [#allocation6], %s1366_s15, %s1366_s15, %s1367_s16  }
  0x33   :  { %1358 = dma.done.wait [#allocation3], 5824  }
  0x34   :  { %1359 = vsyncadd [#allocation3], 4294961472 }
  0x35   :  { %1360 = dma.done.wait [#allocation6], 1024  }
  0x36   :  { %1361 = vsyncadd [#allocation6], 4294966272  ;;  %v1205_v0 = vld [vmem:[#allocation2 + $0x40] sm:$0xff]   ;;  %v1209_v4 = vld [vmem:[#allocation2 + $0x48] sm:$0xff]   ;;  %v1369_v21 = vmov 1966171168   ;;  %v188_v23 = vlaneseq }
  0x37   :  { %v1206_v1 = vld [vmem:[#allocation2] sm:$0xff]   ;;  %1083 = vmatprep.subr.bf16.mxu0 %v1205_v0  ;;  %v1210_v5 = vld [vmem:[#allocation2 + $0x8] sm:$0xff]   ;;  %v1213_v8 = vld [vmem:[#allocation2 + $0x50] sm:$0xff]   ;;  %v186_v22 = vunpack.c.l.s4 %v1369_v21  ;;  %v1370_v41 = vmov 0   ;;  %vm509_vm0 = vcmask 703488   ;;  %vm513_vm1 = vcmask 1042432  }
  0x38   :  { %v1207_v2 = vld [vmem:[#allocation2 + $0xc0] sm:$0xff]   ;;  %1084 = vmatpush3.bf16.msra.mxu0 %v1206_v1  ;;  %v1211_v6 = vld [vmem:[#allocation2 + $0xc8] sm:$0xff]   ;;  %v1214_v9 = vld [vmem:[#allocation2 + $0x10] sm:$0xff]   ;;  %v189_v29 = vshrl.u32 %v188_v23, 7  ;;  %vm1372_vm2 = vmmov 0   ;;  %vm671_vm3 = vcmask 523264  }
  0x39   :  { %v1208_v3 = vld [vmem:[#allocation2 + $0x80] sm:$0xff]   ;;  %1105 = vmatprep.subr.bf16.mxu1 %v1207_v2  ;;  %1085 = vmatprep.subr.bf16.mxu0 %v1209_v4  ;;  %v1212_v7 = vld [vmem:[#allocation2 + $0x88] sm:$0xff]   ;;  %v1215_v10 = vld [vmem:[#allocation2 + $0xd0] sm:$0xff]   ;;  %v187_v28 = vunpack.c.0.s8 %v186_v22  ;;  %s1373_s25 = smov [#allocation8]   ;;  %vm992_vm4 = vcmask 9216  }
  0x3a   :  { %1106 = vmatpush3.bf16.msra.mxu1 %v1208_v3  ;;  %v1216_v11 = vld [vmem:[#allocation2 + $0x90] sm:$0xff]   ;;  %v1217_v12 = vld [vmem:[#allocation2 + $0x58] sm:$0xff]   ;;  %v1221_v16 = vld [vmem:[#allocation2 + $0x60] sm:$0xff]   ;;  %v1371_v3 = vmov 0.0   ;;  %s1000_s26 = sshll.u32 %s1373_s25, 4  ;;  %s1001_s26 = int_to_ptr.vmem [resolvable:$true] %s1000_s26 }
  0x3b   :  { %1107 = vmatprep.subr.bf16.mxu1 %v1211_v6  ;;  %v1218_v13 = vld [vmem:[#allocation2 + $0x18] sm:$0xff]   ;;  %v1222_v17 = vld [vmem:[#allocation2 + $0x20] sm:$0xff]   ;;  %v1225_v20 = vld [vmem:[#allocation2 + $0x68] sm:$0xff]   ;;  %v1491_v34 = vsub.s32 %v187_v28, %v189_v29  ;;  %p1341_p11 = scmp.lt.s32.totalorder %s1001_s26, %s1001_s26 }
  0x3c   :  { %1086 = vmatpush3.bf16.msra.mxu0 %v1210_v5  ;;  %v1219_v14 = vld [vmem:[#allocation2 + $0xd8] sm:$0xff]   ;;  %v1223_v18 = vld [vmem:[#allocation2 + $0xe0] sm:$0xff]   ;;  %v1226_v24 = vld [vmem:[#allocation2 + $0x28] sm:$0xff]  }
  0x3d   :  { %1087 = vmatprep.subr.bf16.mxu0 %v1213_v8  ;;  %v1220_v15 = vld [vmem:[#allocation2 + $0x98] sm:$0xff]   ;;  %v1224_v19 = vld [vmem:[#allocation2 + $0xa0] sm:$0xff]   ;;  %v1227_v25 = vld [vmem:[#allocation2 + $0xe8] sm:$0xff]  }
  0x3e   :  { %1108 = vmatpush3.bf16.msra.mxu1 %v1212_v7  ;;  %v1228_v26 = vld [vmem:[#allocation2 + $0xa8] sm:$0xff]   ;;  %v1229_v27 = vld [vmem:[#allocation2 + $0x70] sm:$0xff]   ;;  %v1233_v33 = vld [vmem:[#allocation2 + $0x78] sm:$0xff]  }
  0x3f   :  { %1109 = vmatprep.subr.bf16.mxu1 %v1215_v10  ;;  %v1230_v30 = vld [vmem:[#allocation2 + $0x30] sm:$0xff]   ;;  %v1234_v35 = vld [vmem:[#allocation2 + $0x38] sm:$0xff]   ;;  %v84_v37 = vld [vmem:[%s1586_s0] sm:$0x3f] }
  0x40   :  { %1088 = vmatpush3.bf16.msra.mxu0 %v1214_v9  ;;  %v1231_v31 = vld [vmem:[#allocation2 + $0xf0] sm:$0xff]   ;;  %v1235_v36 = vld [vmem:[#allocation2 + $0xf8] sm:$0xff]   ;;  %v184_v38 = vcombine.high %v84_v37, %v84_v37  ;;  %v191_v39 = vrot.slane %v84_v37, %v1491_v34  ;;  %v1238_v46 = vld [vmem:[#allocation2 + $0x100] sm:$0xff]  }
  0x41   :  { %1089 = vmatprep.subr.bf16.mxu0 %v1217_v12  ;;  %v1232_v32 = vld [vmem:[#allocation2 + $0xb0] sm:$0xff]   ;;  %v1237_v40 = vld [vmem:[#allocation2 + $0xb8] sm:$0xff]   ;;  %v1239_v51 = vld [vmem:[#allocation2 + $0x108] sm:$0xff]  }
  0x42   :  { %1110 = vmatpush3.bf16.msra.mxu1 %v1216_v11  ;;  %v198_v42 = vrot.slane %v184_v38, %v1491_v34  ;;  %v199_v43 = vcombine.high %v191_v39, %v191_v39  ;;  %v207_v44 = vrot.slane %v191_v39, %v1491_v34  ;;  %v1240_v52 = vld [vmem:[#allocation2 + $0x110] sm:$0xff]   ;;  %v1241_v53 = vld [vmem:[#allocation2 + $0x118] sm:$0xff]   ;;  %v1242_v54 = vld [vmem:[#allocation2 + $0x120] sm:$0xff]  }
  0x43   :  { %1111 = vmatprep.subr.bf16.mxu1 %v1219_v14  ;;  %v1243_v55 = vld [vmem:[#allocation2 + $0x128] sm:$0xff]   ;;  %v1244_v56 = vld [vmem:[#allocation2 + $0x130] sm:$0xff]   ;;  %v1245_v57 = vld [vmem:[#allocation2 + $0x138] sm:$0xff]  }
  0x44   :  { %1090 = vmatpush3.bf16.msra.mxu0 %v1218_v13  ;;  %v221_v45 = vrot.slane %v199_v43, %v1491_v34  ;;  %v200_v47 = vcombine.high %v198_v42, %v198_v42  ;;  %v229_v48 = vcombine.high %v207_v44, %v207_v44  ;;  %v1246_v58 = vld [vmem:[#allocation2 + $0x140] sm:$0xff]   ;;  %v1247_v59 = vld [vmem:[#allocation2 + $0x148] sm:$0xff]   ;;  %v1248_v60 = vld [vmem:[#allocation2 + $0x150] sm:$0xff]   ;;  %v214_v1 = vrot.slane %v198_v42, %v1491_v34 }
  0x45   :  { %1091 = vmatprep.subr.bf16.mxu0 %v1221_v16  ;;  %v1249_v61 = vld [vmem:[#allocation2 + $0x158] sm:$0xff]   ;;  %v1250_v62 = vld [vmem:[#allocation2 + $0x160] sm:$0xff]   ;;  %v1251_v63 = vld [vmem:[#allocation2 + $0x168] ss:$0 sps:$4 sm:$0x77]  }
  0x46   :  { %1112 = vmatpush3.bf16.msra.mxu1 %v1220_v15  ;;  %549 = vmatprep.mubr.bf16.mxu0 %v221_v45  ;;  %v230_v49 = vcombine.high %v221_v45, %v221_v45  ;;  %v228_v50 = vrot.slane %v200_v47, %v1491_v34  ;;  %v515_v0 = vsel %vm513_vm1, %v1251_v63, 0  ;;  %v1252_v2 = vld [vmem:[%s1589_s3] sm:$0xff]   ;;  %v1253_v4 = vld [vmem:[%s1589_s3 + $0x8] sm:$0xff]   ;;  %v1254_v5 = vld [vmem:[%s1589_s3 + $0x10] sm:$0xff]  }
  0x47   :  { %1113 = vmatprep.subr.bf16.mxu1 %v1223_v18  ;;  %v1255_v6 = vld [vmem:[%s1589_s3 + $0x18] sm:$0xff]   ;;  %v1010_v8 = vld [vmem:[%s1588_s2] ss:$0 sm:$0xff]  ;;  %v1259_v34 = vld [vmem:[#allocation5 + $0x18] sm:$0xff]  }
  0x48   :  { %1092 = vmatpush3.bf16.msra.mxu0 %v1222_v17  ;;  %589 = vmatprep.mubr.bf16.mxu1 %v230_v49  ;;  %v1257_v28 = vld [vmem:[#allocation5 + $0x8] sm:$0xff]   ;;  %v1260_v39 = vld [vmem:[#allocation7] sm:$0xff]   ;;  %v1262_v42 = vld [vmem:[#allocation7 + $0x10] sm:$0xff]  }
  0x49   :  { %1093 = vmatprep.subr.bf16.mxu0 %v1225_v20  ;;  %v1263_v43 = vld [vmem:[#allocation7 + $0x18] sm:$0xff]  }
  0x4a   :  { %1114 = vmatpush3.bf16.msra.mxu1 %v1224_v19 }
  0x4b   :  { %1115 = vmatprep.subr.bf16.mxu1 %v1227_v25 }
  0x4c   :  { %1094 = vmatpush3.bf16.msra.mxu0 %v1226_v24 }
  0x4d   :  { %1095 = vmatprep.subr.bf16.mxu0 %v1229_v27  ;;  %v1256_v27 = vld [vmem:[#allocation5] sm:$0xff]  }
  0x4e   :  { %1116 = vmatpush3.bf16.msra.mxu1 %v1228_v26 }
  0x4f   :  { %1117 = vmatprep.subr.bf16.mxu1 %v1231_v31 }
  0x50   :  { %1096 = vmatpush3.bf16.msra.mxu0 %v1230_v30  ;;  %v1258_v30 = vld [vmem:[#allocation5 + $0x10] sm:$0xff]  }
  0x51   :  { %1097 = vmatprep.subr.bf16.mxu0 %v1233_v33 }
  0x52   :  { %1118 = vmatpush3.bf16.msra.mxu1 %v1232_v32 }
  0x53   :  { %1119 = vmatprep.subr.bf16.mxu1 %v1235_v36 }
  0x54   :  { %1098 = vmatpush3.bf16.msra.mxu0 %v1234_v35 }
  0x55   :  { %597 = vmatprep.subr.bf16.mxu0 %v1370_v41 }
  0x56   :  { %1120 = vmatpush3.bf16.msra.mxu1 %v1237_v40 }
  0x57   :  { %550 = vmatmul.mubr.bf16.vlgmr.msra.gmra.mrb[0].mxu0 %v207_v44  ;;  %1147 = vmatprep.subr.bf16.mxu1 %v1371_v3  ;;  %v1063_v44 = vld [vmem:[%s1591_s5] ss:$0 sm:$0xff] }
  0x58   :  { %598 = vmatpush1.bf16.msra.mxu0 %v1238_v46  ;;  %1057 = vmatprep.mubr.msk.bf16.mxu0 %vm509_vm0, %v228_v50 }
  0x59   :  { %590 = vmatmul.mubr.bf16.vlgmr.msra.gmra.mrb[0].mxu1 %v229_v48  ;;  %599 = vmatprep.subr.bf16.mxu0 %v1370_v41 }
  0x5a   :  { %1148 = vmatpush3.bf16.msra.mxu1 %v1252_v2  ;;  %1155 = vmatprep.mubr.msk.bf16.mxu1 %vm1372_vm2, %v1371_v3 }
  0x5b   :  { %1149 = vmatprep.subr.bf16.mxu1 %v1371_v3 }
  0x5c   :  { %600 = vmatpush1.bf16.msra.mxu0 %v1239_v51  ;;  %v1264_v51 = vld [vmem:[%s1594_s8] sm:$0xff]  }
  0x5d   :  { %601 = vmatprep.subr.bf16.mxu0 %v1370_v41 }
  0x5e   :  { %1150 = vmatpush3.bf16.msra.mxu1 %v1253_v4 }
  0x5f   :  { %1151 = vmatprep.subr.bf16.mxu1 %v1371_v3 }
  0x60   :  { %602 = vmatpush1.bf16.msra.mxu0 %v1240_v52 }
  0x61   :  { %603 = vmatprep.subr.bf16.mxu0 %v1370_v41 }
  0x62   :  { %1152 = vmatpush3.bf16.msra.mxu1 %v1254_v5 }
  0x63   :  { %1153 = vmatprep.subr.bf16.mxu1 %v1371_v3 }
  0x64   :  { %604 = vmatpush1.bf16.msra.mxu0 %v1241_v53  ;;  %v1265_v53 = vld [vmem:[%s1594_s8 + $0x8] sm:$0xff]  }
  0x65   :  { %605 = vmatprep.subr.bf16.mxu0 %v1370_v41 }
  0x66   :  { %1154 = vmatpush3.bf16.msra.mxu1 %v1255_v6  ;;  %v1081_v6 = vld [vmem:[%s1596_s10] ss:$0 sm:$0xff] }
  0x67   :  { %1159 = vmatprep.subr.bf16.mxu1 %v1371_v3 }
  0x68   :  { %606 = vmatpush1.bf16.msra.mxu0 %v1242_v54  ;;  %v1266_v54 = vld [vmem:[%s1594_s8 + $0x10] sm:$0xff]  }
  0x69   :  { %607 = vmatprep.subr.bf16.mxu0 %v1370_v41 }
  0x6c   :  { %608 = vmatpush1.bf16.msra.mxu0 %v1243_v55  ;;  %v1267_v55 = vld [vmem:[%s1594_s8 + $0x18] sm:$0xff]  }
  0x6d   :  { %609 = vmatprep.subr.bf16.mxu0 %v1370_v41 }
  0x70   :  { %610 = vmatpush1.bf16.msra.mxu0 %v1244_v56  ;;  %v1069_v56 = vld [vmem:[%s1593_s7] ss:$0 sm:$0xff] }
  0x71   :  { %611 = vmatprep.subr.bf16.mxu0 %v1370_v41 }
  0x74   :  { %612 = vmatpush1.bf16.msra.mxu0 %v1245_v57 }
  0x75   :  { %613 = vmatprep.subr.bf16.mxu0 %v1370_v41 }
  0x78   :  { %614 = vmatpush1.bf16.msra.mxu0 %v1246_v58 }
  0x79   :  { %615 = vmatprep.subr.bf16.mxu0 %v1370_v41 }
  0x7c   :  { %616 = vmatpush1.bf16.msra.mxu0 %v1247_v59 }
  0x7d   :  { %617 = vmatprep.subr.bf16.mxu0 %v1370_v41 }
  0x80   :  { %618 = vmatpush1.bf16.msra.mxu0 %v1248_v60 }
  0x81   :  { %619 = vmatprep.subr.bf16.mxu0 %v1370_v41 }
  0x84   :  { %620 = vmatpush1.bf16.msra.mxu0 %v1249_v61 }
  0x85   :  { %621 = vmatprep.subr.bf16.mxu0 %v1370_v41 }
  0x88   :  { %622 = vmatpush1.bf16.msra.mxu0 %v1250_v62 }
  0x89   :  { %623 = vmatprep.subr.bf16.mxu0 %v1370_v41  ;;  %v1261_v41 = vld [vmem:[#allocation7 + $0x8] sm:$0xff]  }
  0x8c   :  { %624 = vmatpush1.bf16.msra.mxu0 %v515_v0  ;;  %v1075_v0 = vld [vmem:[%s1595_s9] ss:$0 sm:$0xff]  ;;  %s1336_s9 = scalar_lea.vmem %s1001_s26, 32 }
  0x8d   :  { %p1337_p10 = scmp.ne.s32.totalorder %s1001_s26, %s1336_s9  ;;  %p1342_p12 = scmp.lt.s32.totalorder %s1336_s9, %s1336_s9 }
  0x8f   :  { %630 = vmatmul.mubr.bf16.vlgmr.msra.gmra.mrb[4].mxu0 %v214_v1  ;;  %p1343_p13 = por %p1342_p12, %p1341_p11 }
  0x91   :  { %p1344_p0 = pnand %p1343_p13, %p1337_p10 }
 0x12a   :  { %v1099_v7 = vpop.f32.mrb[0].mxu0 }
 0x12b   :  { %v1100_v9 = vpop.f32.mrb[1].mxu0 }
 0x12c   :  { %v1101_v10 = vadd.f32 %v1100_v9, %v1099_v7  ;;  %v1102_v11 = vpop.f32.mrb[2].mxu0  ;;  %v1121_v12 = vpop.f32.mrb[0].mxu1 }
 0x12d   :  { %v1103_v13 = vpop.f32.mrb[3].mxu0  ;;  %v1122_v14 = vpop.f32.mrb[1].mxu1 }
 0x12e   :  { %v552_v15 = vadd.f32 %v1101_v10, %v1010_v8  ;;  %v1123_v16 = vadd.f32 %v1122_v14, %v1121_v12  ;;  %v1124_v17 = vpop.f32.mrb[2].mxu1  ;;  %v1082_v8 = vld [vmem:[%s1597_s11] ss:$0 sm:$0xff] }
 0x12f   :  { %v1125_v18 = vpop.f32.mrb[3].mxu1 }
 0x130   :  { %v592_v19 = vadd.f32 %v1123_v16, %v552_v15 }
 0x162   :  { %v631_v20 = vpop.f32.mrb[4].mxu0 }
 0x163   :  { %v632_v21 = vadd.f32 %v631_v20, %v592_v19  ;;  %v633_v22 = vpop.f32.mrb[5].mxu0 }
 0x164   :  { %v634_v23 = vpop.f32.mrb[6].mxu0 }
 0x165   :  { %v637_v24 = vmax.f32 %v632_v21, 0.0  ;;  %v635_v25 = vpop.f32.mrb[7].mxu0 }
 0x167   :  { %v638_v26 = vpack.c.bf16 %v637_v24, %v637_v24 }
 0x169   :  { %1156 = vmatmul.mubr.msk.bf16.vlgmr.msra.gmra.mrb[4].mxu1 %vm671_vm3, %v638_v26 }
 0x16a   :  { %1167 = vmatprep.mubr.msk.bf16.mxu1 %vm1372_vm2, %v1371_v3  ;;  %1160 = vmatpush3.bf16.msra.mxu1 %v1256_v27 }
 0x16b   :  { %1161 = vmatprep.subr.bf16.mxu1 %v1371_v3 }
 0x16e   :  { %1162 = vmatpush3.bf16.msra.mxu1 %v1257_v28 }
 0x16f   :  { %1163 = vmatprep.subr.bf16.mxu1 %v1371_v3 }
 0x172   :  { %1164 = vmatpush3.bf16.msra.mxu1 %v1258_v30 }
 0x173   :  { %1165 = vmatprep.subr.bf16.mxu1 %v1371_v3 }
 0x176   :  { %1166 = vmatpush3.bf16.msra.mxu1 %v1259_v34 }
 0x177   :  { %1171 = vmatprep.subr.bf16.mxu1 %v1371_v3 }
 0x23c   :  { %v709_v29 = vpop.f32.mrb[4].mxu1 }
 0x23d   :  { %716 = vrot.lane.b32.xlu0 %v709_v29, %s1366_s15  ;;  %v1157_v31 = vpop.f32.mrb[5].mxu1 }
 0x23e   :  { %v712_v32 = vpop.f32.mrb[6].mxu1 }
 0x23f   :  { %v1158_v33 = vpop.f32.mrb[7].mxu1 }
 0x2af   :  { %v717_v35 = vpop.permute.xlu0 %716 }
 0x2b0   :  { %v719_v36 = vadd.f32 %v717_v35, %v632_v21 }
 0x2b2   :  { %v720_v37 = vmax.f32 %v719_v36, 0.0 }
 0x2b4   :  { %v721_v38 = vpack.c.bf16 %v720_v37, %v720_v37 }
 0x2b6   :  { %738 = vrot.lane.b32.xlu0 %v721_v38, %s1366_s15 }
 0x328   :  { %v739_v40 = vpop.permute.xlu0 %738 }
 0x329   :  { %1168 = vmatmul.mubr.msk.bf16.vlgmr.msra.gmra.mrb[8].mxu1 %vm671_vm3, %v739_v40 }
 0x32a   :  { %1172 = vmatpush3.bf16.msra.mxu1 %v1260_v39  ;;  %1179 = vmatprep.mubr.msk.bf16.mxu1 %vm1372_vm2, %v1371_v3 }
 0x32b   :  { %1173 = vmatprep.subr.bf16.mxu1 %v1371_v3 }
 0x32e   :  { %1174 = vmatpush3.bf16.msra.mxu1 %v1261_v41 }
 0x32f   :  { %1175 = vmatprep.subr.bf16.mxu1 %v1371_v3 }
 0x332   :  { %1176 = vmatpush3.bf16.msra.mxu1 %v1262_v42 }
 0x333   :  { %1177 = vmatprep.subr.bf16.mxu1 %v1371_v3 }
 0x336   :  { %1178 = vmatpush3.bf16.msra.mxu1 %v1263_v43 }
 0x337   :  { %1183 = vmatprep.subr.bf16.mxu1 %v1371_v3 }
 0x3fc   :  { %v801_v45 = vpop.f32.mrb[8].mxu1 }
 0x3fd   :  { %v802_v46 = vadd.f32 %v1063_v44, %v801_v45  ;;  %v1169_v47 = vpop.f32.mrb[9].mxu1 }
 0x3fe   :  { %v804_v48 = vpop.f32.mrb[10].mxu1 }
 0x3ff   :  { %v807_v49 = vmax.f32 %v802_v46, 0.0  ;;  %v1170_v50 = vpop.f32.mrb[11].mxu1 }
 0x401   :  { %v808_v52 = vpack.c.bf16 %v807_v49, %v807_v49 }
 0x403   :  { %1180 = vmatmul.mubr.msk.bf16.vlgmr.msra.gmra.mrb[12].mxu1 %vm671_vm3, %v808_v52 }
 0x404   :  { %1184 = vmatpush3.bf16.msra.mxu1 %v1264_v51  ;;  %1191 = vmatprep.mubr.msk.bf16.mxu1 %vm1372_vm2, %v1371_v3 }
 0x405   :  { %1185 = vmatprep.subr.bf16.mxu1 %v1371_v3 }
 0x408   :  { %1186 = vmatpush3.bf16.msra.mxu1 %v1265_v53 }
 0x409   :  { %1187 = vmatprep.subr.bf16.mxu1 %v1371_v3 }
 0x40c   :  { %1188 = vmatpush3.bf16.msra.mxu1 %v1266_v54 }
 0x40d   :  { %1189 = vmatprep.subr.bf16.mxu1 %v1371_v3 }
 0x410   :  { %1190 = vmatpush3.bf16.msra.mxu1 %v1267_v55 }
 0x4d6   :  { %v885_v57 = vpop.f32.mrb[12].mxu1 }
 0x4d7   :  { %v886_v58 = vadd.f32 %v1069_v56, %v885_v57  ;;  %v1181_v59 = vpop.f32.mrb[13].mxu1 }
 0x4d8   :  { %v888_v60 = vpop.f32.mrb[14].mxu1 }
 0x4d9   :  { %v891_v61 = vmax.f32 %v886_v58, 0.0  ;;  %v1182_v62 = vpop.f32.mrb[15].mxu1 }
 0x4db   :  { %v892_v63 = vpack.c.bf16 %v891_v61, %v891_v61 }
 0x4dd   :  { %1192 = vmatmul.mubr.msk.bf16.vlgmr.msra.gmra.mrb[16].mxu1 %vm671_vm3, %v892_v63 }
 0x5b0   :  { %v969_v1 = vpop.f32.mrb[16].mxu1 }
 0x5b1   :  { %v970_v2 = vadd.f32 %v1075_v0, %v969_v1  ;;  %v1193_v3 = vpop.f32.mrb[17].mxu1 }
 0x5b2   :  { %v972_v4 = vpop.f32.mrb[18].mxu1 }
 0x5b3   :  { %1268 = vtanh.f32 %v970_v2  ;;  %v1194_v5 = vpop.f32.mrb[19].mxu1 }
 0x5bd   :  { %v1269_v7 = vpop.eup %1268 }
 0x5be   :  { %v983_v9 = vmul.f32 %v1269_v7, %v1081_v6 }
 0x5c0   :  { %v991_v10 = vadd.f32 %v1082_v8, %v983_v9 }
 0x5c2   :  { %993 = vst.msk [vmem:[#allocation8] sm:$0x3] %vm992_vm4, %v991_v10 }
 0x5c3   :  { %1347 = shalt.err (!%p1344_p0)
}
 0x5c4   :  { %s1348_s28 = scalar_lea.hbm %s1598_s12, 32 }
 0x5c5   :  { %p1349_p1 = scmp.ne.s32.totalorder %s1598_s12, %s1348_s28  ;;  %p1352_p2 = scmp.lt.u32.totalorder %s1348_s28, %s1598_s12 }
 0x5c7   :  { %p1354_p3 = pnand %p1352_p2, %p1349_p1 }
 0x5c9   :  { %1357 = shalt.err (!%p1354_p3)
}
 0x5ca   :  { %1003 = dma.vmem_to_hbm [thread:$0]  %s1001_s26, 32, %s1598_s12, [#allocation4]  }
 0x5cb   :  { %1362 = dma.done.wait [#allocation4], 32  }
 0x5cc   :  { %1363 = vsyncadd [#allocation4], 4294967264 }
 0x5cd   :  { %1007 = vsyncpa [#allocation3], 1 }
 0x5ce   :  { %1008 = vsyncpa [#allocation6], 1 }
 0x5cf   :  { %1009 = vsyncpa [#allocation4], 1 }

</bundles_post_ra>
